<compile_context>
chip_gen: v7x
topology: tpu7x:2x2x1
jax: 0.10.0
libtpu: 0.0.40
codegen_flags: <defaults>
</compile_context>

<pallas_src>
import jax
import jax.numpy as jnp
from jax.experimental import pallas as pl
from jax.experimental.pallas import tpu as pltpu


def _round_up(x, m):
    return (x + m - 1) // m * m


def qvnet_kernel(s_ref, a_ref, w1s_ref, w1a_ref, b1_ref,
                 w2_ref, b2_ref, w3_ref, b3_ref, v_ref):
    # ---- Layer 1: fused "concat" via split weight (bf16 MXU, f32 acc) ----
    s_bf = s_ref[...].astype(jnp.bfloat16)            # (TB, input_dim)
    a_bf = a_ref[...].astype(jnp.bfloat16)            # (TB, n_actions)
    h1 = jnp.dot(s_bf, w1s_ref[...], preferred_element_type=jnp.float32)
    h1 = h1 + jnp.dot(a_bf, w1a_ref[...], preferred_element_type=jnp.float32)
    h1 = jnp.maximum(h1 + b1_ref[...], 0.0)           # (TB, 256) f32

    # ---- Layer 2 (bf16 MXU, f32 acc) ----
    h2 = jnp.dot(h1.astype(jnp.bfloat16), w2_ref[...],
                 preferred_element_type=jnp.float32)
    h2 = jnp.maximum(h2 + b2_ref[...], 0.0)           # (TB, 256) f32

    # ---- Value head: N=1 matmul replaced with VPU mul + XLU lane-reduce ----
    w3_row = w3_ref[...].astype(jnp.float32)           # (1, 256)
    v = jnp.sum(h2 * w3_row, axis=-1, keepdims=True)   # (TB, 1)
    v_ref[...] = v + b3_ref[0, 0]                      # scalar bias from SMEM


def qvnet_forward(s, a, params, *, block_b=512):
    """s: (B, input_dim), a: (B, n_actions) -> v: (B, 1) float32."""
    w1, b1, w2, b2, w3, b3 = params
    B, input_dim = s.shape
    n_actions = a.shape[1]
    hidden = w2.shape[0]

    # bf16 weights: halve HBM->VMEM DMA; split W1 so no host-side concat.
    w1_s = w1[:input_dim].astype(jnp.bfloat16)            # (input_dim, 256)
    w1_a = w1[input_dim:].astype(jnp.bfloat16)            # (n_actions, 256)
    w2_bf = w2.astype(jnp.bfloat16)                       # (256, 256)
    w3_row = w3.reshape(1, hidden).astype(jnp.bfloat16)   # (1, 256)
    b1_f = b1.reshape(1, hidden).astype(jnp.float32)
    b2_f = b2.reshape(1, hidden).astype(jnp.float32)
    b3_f = b3.reshape(1, 1).astype(jnp.float32)

    s = s.astype(jnp.float32)
    a = a.astype(jnp.float32)

    # Batch tile: whole batch when small, else grid over batch with resident
    # weights (constant index_map -> no re-DMA across tiles).
    tb = min(block_b, _round_up(B, 8))
    pad_b = _round_up(B, tb)
    if pad_b != B:
        s = jnp.pad(s, ((0, pad_b - B), (0, 0)))
        a = jnp.pad(a, ((0, pad_b - B), (0, 0)))
    grid = (pad_b // tb,)

    const = lambda i: (0, 0)

    flops = 2 * B * ((input_dim + n_actions) * hidden + hidden * hidden + hidden)
    bytes_accessed = (
        int(w1_s.size + w1_a.size + w2_bf.size + w3_row.size) * 2     # bf16 weights
        + int(b1_f.size + b2_f.size + b3_f.size) * 4                  # f32 biases
        + B * (input_dim + n_actions + 1) * 4)                        # s, a, v

    out = pl.pallas_call(
        qvnet_kernel,
        out_shape=jax.ShapeDtypeStruct((pad_b, 1), jnp.float32),
        grid=grid,
        in_specs=[
            pl.BlockSpec((tb, input_dim), lambda i: (i, 0)),   # s tile
            pl.BlockSpec((tb, n_actions), lambda i: (i, 0)),   # a tile
            pl.BlockSpec((input_dim, hidden), const),          # W1_s (resident)
            pl.BlockSpec((n_actions, hidden), const),          # W1_a (resident)
            pl.BlockSpec((1, hidden), const),                  # b1
            pl.BlockSpec((hidden, hidden), const),             # W2 (resident)
            pl.BlockSpec((1, hidden), const),                  # b2
            pl.BlockSpec((1, hidden), const),                  # w3 row
            pl.BlockSpec(memory_space=pltpu.MemorySpace.SMEM), # b3 scalar
        ],
        out_specs=pl.BlockSpec((tb, 1), lambda i: (i, 0)),
        compiler_params=pltpu.CompilerParams(
            dimension_semantics=("parallel",)),
        cost_estimate=pl.CostEstimate(
            flops=int(flops), transcendentals=0,
            bytes_accessed=int(bytes_accessed)),
    )(s, a, w1_s, w1_a, b1_f, w2_bf, b2_f, w3_row, b3_f)
    return out[:B]


def init_params(key, input_dim, n_actions, hidden=256):
    """PyTorch-Linear-style init: U(-1/sqrt(fan_in), 1/sqrt(fan_in)), f32 masters."""
    def linear(k, fan_in, fan_out):
        kw, kb = jax.random.split(k)
        bound = 1.0 / jnp.sqrt(jnp.float32(fan_in))
        w = jax.random.uniform(kw, (fan_in, fan_out), jnp.float32, -bound, bound)
        b = jax.random.uniform(kb, (1, fan_out), jnp.float32, -bound, bound)
        return w, b

    k1, k2, k3 = jax.random.split(key, 3)
    w1, b1 = linear(k1, input_dim + n_actions, hidden)
    w2, b2 = linear(k2, hidden, hidden)
    w3, b3 = linear(k3, hidden, 1)
    return (w1, b1, w2, b2, w3, b3)


def qvnet_reference_f32(s, a, params):
    """Exact f32 PyTorch-equivalent forward."""
    w1, b1, w2, b2, w3, b3 = params
    x = jnp.concatenate([s, a], axis=1)
    x = jnp.maximum(x @ w1 + b1, 0.0)
    x = jnp.maximum(x @ w2 + b2, 0.0)
    return x @ w3 + b3


def qvnet_reference_bf16(s, a, params):
    """Pure-JAX reference that mirrors the kernel's bf16-weight / f32-acc math."""
    w1, b1, w2, b2, w3, b3 = params
    x = jnp.concatenate([s, a], axis=1).astype(jnp.bfloat16)
    h1 = jnp.dot(x, w1.astype(jnp.bfloat16), preferred_element_type=jnp.float32)
    h1 = jnp.maximum(h1 + b1, 0.0)
    h2 = jnp.dot(h1.astype(jnp.bfloat16), w2.astype(jnp.bfloat16),
                 preferred_element_type=jnp.float32)
    h2 = jnp.maximum(h2 + b2, 0.0)
    return h2 @ w3.astype(jnp.bfloat16).astype(jnp.float32) + b3


if __name__ == "__main__":
    key = jax.random.PRNGKey(0)
    k_s, k_a, k_p, k_s2, k_a2 = jax.random.split(key, 5)

    batch = 8
    input_dim = 16
    n_actions = 4

    s = jax.random.normal(k_s, (batch, input_dim), jnp.float32)
    a = jax.random.normal(k_a, (batch, n_actions), jnp.float32)
    params = init_params(k_p, input_dim, n_actions)

    fwd = jax.jit(qvnet_forward)
    v = jax.block_until_ready(fwd(s, a, params))
    assert v.shape == (batch, 1)

    v_bf = qvnet_reference_bf16(s, a, params)
    v_f32 = qvnet_reference_f32(s, a, params)
    assert jnp.allclose(v, v_bf, atol=2e-3, rtol=2e-3), "mismatch vs bf16 reference"
    assert jnp.allclose(v, v_f32, atol=5e-2, rtol=5e-2), "mismatch vs f32 reference"

    # Exercise the batch grid + padding path (grid > 1, weights resident).
    B2 = 72
    s2 = jax.random.normal(k_s2, (B2, input_dim), jnp.float32)
    a2 = jax.random.normal(k_a2, (B2, n_actions), jnp.float32)
    v2 = jax.block_until_ready(qvnet_forward(s2, a2, params, block_b=32))
    assert v2.shape == (B2, 1)
    assert jnp.allclose(v2, qvnet_reference_bf16(s2, a2, params),
                        atol=2e-3, rtol=2e-3), "mismatch vs bf16 reference (gridded)"

    print("KERNEL_OK")
</pallas_src>

<mosaic_0001>
module attributes {stable_mosaic.version = 11 : i64} {
  func.func @qvnet_kernel(%arg0: i32, %arg1: memref<8x16xf32, #tpu.memory_space<vmem>>, %arg2: memref<8x4xf32, #tpu.memory_space<vmem>>, %arg3: memref<16x256xbf16, #tpu.memory_space<vmem>>, %arg4: memref<4x256xbf16, #tpu.memory_space<vmem>>, %arg5: memref<1x256xf32, #tpu.memory_space<vmem>>, %arg6: memref<256x256xbf16, #tpu.memory_space<vmem>>, %arg7: memref<1x256xf32, #tpu.memory_space<vmem>>, %arg8: memref<1x256xbf16, #tpu.memory_space<vmem>>, %arg9: memref<1x1xf32, #tpu.memory_space<smem>>, %arg10: memref<8x1xf32, #tpu.memory_space<vmem>>) attributes {dimension_semantics = [#tpu.dimension_semantics<parallel>], iteration_bounds = array<i64: 1>, scalar_prefetch = 0 : i64, scratch_operands = 0 : i64, tpu.core_type = #tpu.core_type<tc>, window_params = [{transform_indices = @transform_0, window_bounds = array<i64: 8, 16>}, {transform_indices = @transform_1, window_bounds = array<i64: 8, 4>}, {pipeline_mode = #tpu.pipeline_mode<synchronous>, transform_indices = @transform_2, window_bounds = array<i64: 16, 256>}, {pipeline_mode = #tpu.pipeline_mode<synchronous>, transform_indices = @transform_3, window_bounds = array<i64: 4, 256>}, {pipeline_mode = #tpu.pipeline_mode<synchronous>, transform_indices = @transform_4, window_bounds = array<i64: 1, 256>}, {pipeline_mode = #tpu.pipeline_mode<synchronous>, transform_indices = @transform_5, window_bounds = array<i64: 256, 256>}, {pipeline_mode = #tpu.pipeline_mode<synchronous>, transform_indices = @transform_6, window_bounds = array<i64: 1, 256>}, {pipeline_mode = #tpu.pipeline_mode<synchronous>, transform_indices = @transform_7, window_bounds = array<i64: 1, 256>}, {transform_indices = @transform_8, window_bounds = array<i64: 1, 1>}, {transform_indices = @transform_9, window_bounds = array<i64: 8, 1>}]} {
    %c0 = arith.constant 0 : index
    %c0_0 = arith.constant 0 : index
    %0 = vector.load %arg1[%c0, %c0_0] : memref<8x16xf32, #tpu.memory_space<vmem>>, vector<8x16xf32>
    %1 = arith.truncf %0 : vector<8x16xf32> to vector<8x16xbf16>
    %c0_1 = arith.constant 0 : index
    %c0_2 = arith.constant 0 : index
    %2 = vector.load %arg2[%c0_1, %c0_2] : memref<8x4xf32, #tpu.memory_space<vmem>>, vector<8x4xf32>
    %3 = arith.truncf %2 : vector<8x4xf32> to vector<8x4xbf16>
    %c0_3 = arith.constant 0 : index
    %c0_4 = arith.constant 0 : index
    %4 = vector.load %arg3[%c0_3, %c0_4] : memref<16x256xbf16, #tpu.memory_space<vmem>>, vector<16x256xbf16>
    %cst = arith.constant dense<0.000000e+00> : vector<8x256xf32>
    %5 = tpu.matmul %1, %4, %cst {dimension_numbers = #tpu.dot_dimension_numbers<[1], [0], [0], [1], [0, 0, 1, 1], [], []>} : vector<8x16xbf16>, vector<16x256xbf16>, vector<8x256xf32> -> vector<8x256xf32>
    %c0_5 = arith.constant 0 : index
    %c0_6 = arith.constant 0 : index
    %6 = vector.load %arg4[%c0_5, %c0_6] : memref<4x256xbf16, #tpu.memory_space<vmem>>, vector<4x256xbf16>
    %cst_7 = arith.constant dense<0.000000e+00> : vector<8x256xf32>
    %7 = tpu.matmul %3, %6, %cst_7 {dimension_numbers = #tpu.dot_dimension_numbers<[1], [0], [0], [1], [0, 0, 1, 1], [], []>} : vector<8x4xbf16>, vector<4x256xbf16>, vector<8x256xf32> -> vector<8x256xf32>
    %8 = arith.addf %5, %7 : vector<8x256xf32>
    %c0_8 = arith.constant 0 : index
    %c0_9 = arith.constant 0 : index
    %9 = vector.load %arg5[%c0_8, %c0_9] : memref<1x256xf32, #tpu.memory_space<vmem>>, vector<1x256xf32>
    %10 = vector.broadcast %9 : vector<1x256xf32> to vector<8x256xf32>
    %11 = arith.addf %8, %10 : vector<8x256xf32>
    %cst_10 = arith.constant 0.000000e+00 : f32
    %12 = vector.broadcast %cst_10 : f32 to vector<8x256xf32>
    %13 = arith.maximumf %11, %12 : vector<8x256xf32>
    %14 = arith.truncf %13 : vector<8x256xf32> to vector<8x256xbf16>
    %c0_11 = arith.constant 0 : index
    %c0_12 = arith.constant 0 : index
    %15 = vector.load %arg6[%c0_11, %c0_12] : memref<256x256xbf16, #tpu.memory_space<vmem>>, vector<256x256xbf16>
    %cst_13 = arith.constant dense<0.000000e+00> : vector<8x256xf32>
    %16 = tpu.matmul %14, %15, %cst_13 {dimension_numbers = #tpu.dot_dimension_numbers<[1], [0], [0], [1], [0, 0, 1, 1], [], []>} : vector<8x256xbf16>, vector<256x256xbf16>, vector<8x256xf32> -> vector<8x256xf32>
    %c0_14 = arith.constant 0 : index
    %c0_15 = arith.constant 0 : index
    %17 = vector.load %arg7[%c0_14, %c0_15] : memref<1x256xf32, #tpu.memory_space<vmem>>, vector<1x256xf32>
    %18 = vector.broadcast %17 : vector<1x256xf32> to vector<8x256xf32>
    %19 = arith.addf %16, %18 : vector<8x256xf32>
    %cst_16 = arith.constant 0.000000e+00 : f32
    %20 = vector.broadcast %cst_16 : f32 to vector<8x256xf32>
    %21 = arith.maximumf %19, %20 : vector<8x256xf32>
    %c0_17 = arith.constant 0 : index
    %c0_18 = arith.constant 0 : index
    %22 = vector.load %arg8[%c0_17, %c0_18] : memref<1x256xbf16, #tpu.memory_space<vmem>>, vector<1x256xbf16>
    %23 = arith.extf %22 : vector<1x256xbf16> to vector<1x256xf32>
    %24 = vector.broadcast %23 : vector<1x256xf32> to vector<8x256xf32>
    %25 = arith.mulf %21, %24 : vector<8x256xf32>
    %cst_19 = arith.constant dense<0.000000e+00> : vector<8xf32>
    %26 = vector.multi_reduction <add>, %25, %cst_19 [1] : vector<8x256xf32> to vector<8xf32>
    %27 = vector.shape_cast %26 : vector<8xf32> to vector<8x1xf32>
    %c0_20 = arith.constant 0 : index
    %c0_21 = arith.constant 0 : index
    %28 = memref.load %arg9[%c0_20, %c0_21] : memref<1x1xf32, #tpu.memory_space<smem>>
    %29 = vector.broadcast %28 : f32 to vector<8x1xf32>
    %30 = arith.addf %27, %29 : vector<8x1xf32>
    %c0_22 = arith.constant 0 : index
    %c0_23 = arith.constant 0 : index
    %31 = vector.load %arg10[%c0_22, %c0_23] : memref<8x1xf32, #tpu.memory_space<vmem>>, vector<8x1xf32>
    tpu.vector_store %arg10[%c0_22, %c0_23], %30 {strides = array<i32>} : memref<8x1xf32, #tpu.memory_space<vmem>>, vector<8x1xf32>,
    return
  }
  func.func @transform_0(%arg0: i32) -> (i32, i32) {
    %c0_i32 = arith.constant 0 : i32
    %c0_i32_0 = arith.constant 0 : i32
    return %arg0, %c0_i32 : i32, i32
  }
  func.func @transform_1(%arg0: i32) -> (i32, i32) {
    %c0_i32 = arith.constant 0 : i32
    %c0_i32_0 = arith.constant 0 : i32
    return %arg0, %c0_i32 : i32, i32
  }
  func.func @transform_2(%arg0: i32) -> (i32, i32) {
    %c0_i32 = arith.constant 0 : i32
    %c0_i32_0 = arith.constant 0 : i32
    %c0_i32_1 = arith.constant 0 : i32
    return %c0_i32, %c0_i32_0 : i32, i32
  }
  func.func @transform_3(%arg0: i32) -> (i32, i32) {
    %c0_i32 = arith.constant 0 : i32
    %c0_i32_0 = arith.constant 0 : i32
    %c0_i32_1 = arith.constant 0 : i32
    return %c0_i32, %c0_i32_0 : i32, i32
  }
  func.func @transform_4(%arg0: i32) -> (i32, i32) {
    %c0_i32 = arith.constant 0 : i32
    %c0_i32_0 = arith.constant 0 : i32
    %c0_i32_1 = arith.constant 0 : i32
    return %c0_i32, %c0_i32_0 : i32, i32
  }
  func.func @transform_5(%arg0: i32) -> (i32, i32) {
    %c0_i32 = arith.constant 0 : i32
    %c0_i32_0 = arith.constant 0 : i32
    %c0_i32_1 = arith.constant 0 : i32
    return %c0_i32, %c0_i32_0 : i32, i32
  }
  func.func @transform_6(%arg0: i32) -> (i32, i32) {
    %c0_i32 = arith.constant 0 : i32
    %c0_i32_0 = arith.constant 0 : i32
    %c0_i32_1 = arith.constant 0 : i32
    return %c0_i32, %c0_i32_0 : i32, i32
  }
  func.func @transform_7(%arg0: i32) -> (i32, i32) {
    %c0_i32 = arith.constant 0 : i32
    %c0_i32_0 = arith.constant 0 : i32
    %c0_i32_1 = arith.constant 0 : i32
    return %c0_i32, %c0_i32_0 : i32, i32
  }
  func.func @transform_8(%arg0: i32) -> (i32, i32) {
    %c0_i32 = arith.constant 0 : i32
    %c0_i32_0 = arith.constant 0 : i32
    %c0_i32_1 = arith.constant 0 : i32
    return %c0_i32, %c0_i32_0 : i32, i32
  }
  func.func @transform_9(%arg0: i32) -> (i32, i32) {
    %c0_i32 = arith.constant 0 : i32
    %c0_i32_0 = arith.constant 0 : i32
    return %arg0, %c0_i32 : i32, i32
  }
}

</mosaic_0001>

<bundles_post_ra>
// kernel: qvnet_forward.1
= control target key start
LH: loop header
LB: loop body
LE: loop exit
PB: predicated region body
PF: predicated region fallthrough
CT: control target
= control target key end

     0   :  { %vm54_vm0 = vcmask 1041408   ;;  %v547_v1 = vmov 0   ;;  %vm50_vm1 = vcmask 31744   ;;  %vm112_vm2 = vcmask 130048   ;;  %s724_s3 = inlined_call_operand.vmem [shape: bf16[4,256], index: 3, kind: input, shape index: {}]   ;;  %s725_s1 = inlined_call_operand.vmem [shape: f32[8,4], index: 1, kind: input, shape index: {}]   ;;  %s726_s2 = inlined_call_operand.vmem [shape: bf16[16,256], index: 2, kind: input, shape index: {}]   ;;  %s727_s5 = inlined_call_operand.vmem [shape: bf16[256,256], index: 5, kind: input, shape index: {}]   ;;  %s728_s0 = inlined_call_operand.vmem [shape: f32[8,16], index: 0, kind: input, shape index: {}]   ;;  %s729_s4 = inlined_call_operand.vmem [shape: f32[1,256], index: 4, kind: input, shape index: {}]   ;;  %s730_s7 = inlined_call_operand.vmem [shape: bf16[1,256], index: 7, kind: input, shape index: {}]   ;;  %s731_s6 = inlined_call_operand.vmem [shape: f32[1,256], index: 6, kind: input, shape index: {}]   ;;  %s732_s8 = inlined_call_operand.<no memory space> [shape: f32[1,1], index: 8, kind: input, shape index: {}]   ;;  %s733_s9 = inlined_call_operand.vmem [shape: f32[8,1], index: 9, kind: output, shape index: {}]  }
   0x1   :  { %v457_v0 = vld.sshfl [vmem:[%s724_s3] sm:$0x33 pattern:$0x76325410]  ;;  %93 = vmatprep.mubr.bf16.mxu1 %v547_v1  ;;  %v498_v5 = vld [vmem:[%s726_s2 + $0x4] ss:$8 sps:$4 sm:$0xff]   ;;  %v159_v42 = vlaneseq }
   0x2   :  { %v36_v2 = vld [vmem:[%s725_s1] sm:$0xff]  ;;  %v49_v3 = vcombine.high %v457_v0, %v457_v0  ;;  %v56_v4 = vsel %vm54_vm0, %v457_v0, 0  ;;  %v502_v10 = vld [vmem:[%s727_s5 + $0x14] ss:$8 sps:$4 sm:$0xff]   ;;  %v504_v11 = vld [vmem:[%s727_s5 + $0x10] ss:$8 sps:$4 sm:$0xff]  }
   0x3   :  { %v37_v6 = vpack.c.bf16 %v36_v2, %v36_v2  ;;  %v499_v7 = vld [vmem:[%s727_s5 + $0x4] ss:$8 sps:$4 sm:$0xff]   ;;  %v501_v8 = vld [vmem:[%s727_s5] ss:$8 sps:$4 sm:$0xff]   ;;  %v508_v16 = vld [vmem:[%s727_s5 + $0x34] ss:$8 sps:$4 sm:$0xff]  }
   0x4   :  { %458 = vmatprep.subr.msk.bf16.mxu1 %vm54_vm0, %v49_v3  ;;  %v496_v9 = vld [vmem:[%s726_s2] ss:$8 sps:$4 sm:$0xff]   ;;  %379 = vmatprep.subr.bf16.mxu0 %v499_v7  ;;  %v505_v12 = vld [vmem:[%s727_s5 + $0x24] ss:$8 sps:$4 sm:$0xff]   ;;  %v510_v17 = vld [vmem:[%s727_s5 + $0x30] ss:$8 sps:$4 sm:$0xff]  }
   0x5   :  { %62 = vmatpush1.bf16.msra.mxu1 %v56_v4  ;;  %380 = vmatpush1.bf16.msra.mxu0 %v501_v8  ;;  %v34_v13 = vld [vmem:[%s728_s0] sm:$0xff]  ;;  %v514_v20 = vld [vmem:[%s727_s5 + $0x54] ss:$8 sps:$4 sm:$0xff]   ;;  %v516_v21 = vld [vmem:[%s727_s5 + $0x50] ss:$8 sps:$4 sm:$0xff]   ;;  %v160_v43 = vshrl.u32 %v159_v42, 7 }
   0x6   :  { %116 = vmatprep.subr.bf16.mxu1 %v498_v5  ;;  %381 = vmatprep.subr.bf16.mxu0 %v502_v10  ;;  %v507_v14 = vld [vmem:[%s727_s5 + $0x20] ss:$8 sps:$4 sm:$0xff]   ;;  %v35_v15 = vpack.c.bf16 %v34_v13, %v34_v13  ;;  %v511_v18 = vld [vmem:[%s727_s5 + $0x44] ss:$8 sps:$4 sm:$0xff]   ;;  %v520_v24 = vld [vmem:[%s727_s5 + $0x74] ss:$8 sps:$4 sm:$0xff]  }
   0x7   :  { %v513_v19 = vld [vmem:[%s727_s5 + $0x40] ss:$8 sps:$4 sm:$0xff]   ;;  %v517_v22 = vld [vmem:[%s727_s5 + $0x64] ss:$8 sps:$4 sm:$0xff]   ;;  %v522_v25 = vld [vmem:[%s727_s5 + $0x70] ss:$8 sps:$4 sm:$0xff]  }
   0x8   :  { %459 = vmatmul.mubr.msk.bf16.vlgmr.msra.gmra.mrb[0].mxu1 %vm50_vm1, %v37_v6  ;;  %v519_v23 = vld [vmem:[%s727_s5 + $0x60] ss:$8 sps:$4 sm:$0xff]   ;;  %v523_v26 = vld [vmem:[%s727_s5 + $0x84] ss:$8 sps:$4 sm:$0xff]   ;;  %v526_v28 = vld [vmem:[%s727_s5 + $0x94] ss:$8 sps:$4 sm:$0xff]  }
   0x9   :  { %117 = vmatpush1.bf16.msra.mxu1 %v496_v9  ;;  %148 = vmatprep.mubr.bf16.mxu1 %v547_v1  ;;  %v525_v27 = vld [vmem:[%s727_s5 + $0x80] ss:$8 sps:$4 sm:$0xff]   ;;  %v528_v29 = vld [vmem:[%s727_s5 + $0x90] ss:$8 sps:$4 sm:$0xff]   ;;  %v529_v30 = vld [vmem:[%s727_s5 + $0xa4] ss:$8 sps:$4 sm:$0xff]  }
   0xa   :  { %382 = vmatpush1.bf16.msra.mxu0 %v504_v11  ;;  %v531_v31 = vld [vmem:[%s727_s5 + $0xa0] ss:$8 sps:$4 sm:$0xff]   ;;  %v532_v32 = vld [vmem:[%s727_s5 + $0xb4] ss:$8 sps:$4 sm:$0xff]   ;;  %v534_v33 = vld [vmem:[%s727_s5 + $0xb0] ss:$8 sps:$4 sm:$0xff]  }
   0xb   :  { %383 = vmatprep.subr.bf16.mxu0 %v505_v12  ;;  %v535_v34 = vld [vmem:[%s727_s5 + $0xc4] ss:$8 sps:$4 sm:$0xff]   ;;  %v537_v35 = vld [vmem:[%s727_s5 + $0xc0] ss:$8 sps:$4 sm:$0xff]   ;;  %v538_v36 = vld [vmem:[%s727_s5 + $0xd4] ss:$8 sps:$4 sm:$0xff]  }
   0xc   :  { %v540_v37 = vld [vmem:[%s727_s5 + $0xd0] ss:$8 sps:$4 sm:$0xff]   ;;  %v541_v38 = vld [vmem:[%s727_s5 + $0xe4] ss:$8 sps:$4 sm:$0xff]   ;;  %v543_v39 = vld [vmem:[%s727_s5 + $0xe0] ss:$8 sps:$4 sm:$0xff]  }
   0xd   :  { %v544_v40 = vld [vmem:[%s727_s5 + $0xf4] ss:$8 sps:$4 sm:$0xff]   ;;  %v546_v41 = vld [vmem:[%s727_s5 + $0xf0] ss:$8 sps:$4 sm:$0xff]   ;;  %v161_v48 = vsub.s32 0, %v160_v43  ;;  %v165_v50 = vsub.s32 1, %v160_v43 }
   0xe   :  { %384 = vmatpush1.bf16.msra.mxu0 %v507_v14  ;;  %v157_v49 = vld [vmem:[%s729_s4] sm:$0x3]  ;;  %v431_v4 = vsub.s32 2, %v160_v43  ;;  %vm451_vm3 = vcmask 7168  }
   0xf   :  { %385 = vmatprep.subr.bf16.mxu0 %v508_v16  ;;  %v162_v51 = vrot.slane %v157_v49, %v161_v48  ;;  %v166_v53 = vrot.slane %v157_v49, %v165_v50  ;;  %v422_v1 = vld [vmem:[%s730_s7] sm:$0x3] }
  0x10   :  { %462 = vmatmul.mubr.msk.bf16.vlgmr.msra.gmra.mrb[4].mxu1 %vm112_vm2, %v35_v15  ;;  %v423_v2 = vunpack.c.l.bf16 %v422_v1  ;;  %v207_v3 = vld [vmem:[%s731_s6] sm:$0x3] }
  0x11   :  { %v212_v5 = vrot.slane %v207_v3, %v161_v48  ;;  %v216_v7 = vrot.slane %v207_v3, %v165_v50 }
  0x12   :  { %386 = vmatpush1.bf16.msra.mxu0 %v510_v17  ;;  %v428_v6 = vrot.slane %v423_v2, %v161_v48  ;;  %v432_v8 = vrot.slane %v423_v2, %v431_v4 }
  0x13   :  { %387 = vmatprep.subr.bf16.mxu0 %v511_v18 }
  0x14   :  { %v438_v12 = vrot.slane %v428_v6, %v161_v48  ;;  %v442_v15 = vrot.slane %v432_v8, %v161_v48 }
  0x16   :  { %388 = vmatpush1.bf16.msra.mxu0 %v513_v19 }
  0x17   :  { %389 = vmatprep.subr.bf16.mxu0 %v514_v20 }
  0x1a   :  { %390 = vmatpush1.bf16.msra.mxu0 %v516_v21 }
  0x1b   :  { %391 = vmatprep.subr.bf16.mxu0 %v517_v22  ;;  %v449_v22 = vstv %s732_s8 }
  0x1e   :  { %392 = vmatpush1.bf16.msra.mxu0 %v519_v23 }
  0x1f   :  { %393 = vmatprep.subr.bf16.mxu0 %v520_v24 }
  0x22   :  { %394 = vmatpush1.bf16.msra.mxu0 %v522_v25 }
  0x23   :  { %395 = vmatprep.subr.bf16.mxu0 %v523_v26 }
  0x26   :  { %396 = vmatpush1.bf16.msra.mxu0 %v525_v27 }
  0x27   :  { %397 = vmatprep.subr.bf16.mxu0 %v526_v28 }
  0x2a   :  { %398 = vmatpush1.bf16.msra.mxu0 %v528_v29 }
  0x2b   :  { %399 = vmatprep.subr.bf16.mxu0 %v529_v30 }
  0x2e   :  { %400 = vmatpush1.bf16.msra.mxu0 %v531_v31 }
  0x2f   :  { %401 = vmatprep.subr.bf16.mxu0 %v532_v32 }
  0x32   :  { %402 = vmatpush1.bf16.msra.mxu0 %v534_v33 }
  0x33   :  { %403 = vmatprep.subr.bf16.mxu0 %v535_v34 }
  0x36   :  { %404 = vmatpush1.bf16.msra.mxu0 %v537_v35 }
  0x37   :  { %405 = vmatprep.subr.bf16.mxu0 %v538_v36 }
  0x3a   :  { %406 = vmatpush1.bf16.msra.mxu0 %v540_v37 }
  0x3b   :  { %407 = vmatprep.subr.bf16.mxu0 %v541_v38 }
  0x3e   :  { %408 = vmatpush1.bf16.msra.mxu0 %v543_v39 }
  0x3f   :  { %409 = vmatprep.subr.bf16.mxu0 %v544_v40 }
  0x42   :  { %410 = vmatpush1.bf16.msra.mxu0 %v546_v41 }
  0xdb   :  { %v95_v44 = vpop.f32.mrb[0].mxu1 }
  0xdc   :  { %v97_v45 = vpop.f32.mrb[1].mxu1 }
  0xdd   :  { %v99_v46 = vpop.f32.mrb[2].mxu1 }
  0xde   :  { %v100_v47 = vpop.f32.mrb[3].mxu1 }
  0xe3   :  { %v150_v52 = vpop.f32.mrb[4].mxu1 }
  0xe4   :  { %v151_v54 = vadd.f32 %v150_v52, %v95_v44  ;;  %v152_v55 = vpop.f32.mrb[5].mxu1 }
  0xe5   :  { %v153_v56 = vadd.f32 %v152_v55, %v97_v45  ;;  %v154_v57 = vpop.f32.mrb[6].mxu1 }
  0xe6   :  { %v169_v58 = vadd.f32 %v162_v51, %v151_v54  ;;  %v155_v59 = vpop.f32.mrb[7].mxu1 }
  0xe7   :  { %v170_v60 = vadd.f32 %v166_v53, %v153_v56 }
  0xe8   :  { %v171_v61 = vmax.f32 %v169_v58, 0.0 }
  0xe9   :  { %v172_v62 = vmax.f32 %v170_v60, 0.0 }
  0xea   :  { %v173_v0 = vpack.c.bf16 %v171_v61, %v171_v61 }
  0xeb   :  { %v174_v63 = vpack.c.bf16 %v172_v62, %v172_v62 }
  0xed   :  { %411 = vmatprep.mubr.bf16.mxu0 %v174_v63 }
  0xee   :  { %412 = vmatmul.mubr.bf16.vlgmr.msra.gmra.mrb[0].mxu0 %v173_v0 }
 0x1c1   :  { %v413_v9 = vpop.f32.mrb[0].mxu0 }
 0x1c2   :  { %v414_v10 = vadd.f32 %v413_v9, %v212_v5  ;;  %v415_v11 = vpop.f32.mrb[1].mxu0 }
 0x1c3   :  { %v416_v13 = vadd.f32 %v415_v11, %v216_v7  ;;  %v417_v14 = vpop.f32.mrb[2].mxu0 }
 0x1c4   :  { %v420_v16 = vmax.f32 %v414_v10, 0.0  ;;  %v418_v17 = vpop.f32.mrb[3].mxu0 }
 0x1c5   :  { %v421_v18 = vmax.f32 %v416_v13, 0.0 }
 0x1c6   :  { %v443_v19 = vmul.f32 %v438_v12, %v420_v16 }
 0x1c7   :  { %v444_v20 = vmul.f32 %v442_v15, %v421_v18 }
 0x1c9   :  { %v445_v21 = vadd.f32 %v444_v20, %v443_v19 }
 0x1cb   :  { %446 = vadd.xlane.f32.xlu0 %v445_v21 }
 0x258   :  { %v447_v23 = vpop.xlane.xlu0 %446 }
 0x259   :  { %v450_v24 = vadd.f32 %v449_v22, %v447_v23 }
 0x25b   :  { %452 = vst.msk [vmem:[%s733_s9] sm:$0xff] %vm451_vm3, %v450_v24 }

</bundles_post_ra>
